<compile_context>
chip_gen: v6e
topology: v6e:2x2x1
jax: 0.10.0
libtpu: 0.0.40
codegen_flags: <defaults>
</compile_context>

<pallas_src>
import jax
import jax.numpy as jnp
import numpy as np
from jax.experimental import pallas as pl
from jax.experimental.pallas import tpu as pltpu

EPS = 1e-5


def _fold_conv_weights(w_hwio, width):
    """Fold the horizontal taps (+ horizontal 'same' zero padding) of a 3x3 conv
    over rows of `width` pixels into one matmul weight per VERTICAL tap.

    w_hwio: (3, 3, ci, co)  ->  (3, width*ci, width*co)
      [dy]  row index = wx*ci + c   (input col wx, in-chan c)
            col index = w*co + o    (output col w, out-chan o)
    """
    kh, kw, ci, co = w_hwio.shape
    p = np.zeros((kw, width, width), np.float32)          # p[dx, wx, w]
    for dx in range(kw):
        for w in range(width):
            wx = w + dx - 1
            if 0 <= wx < width:
                p[dx, wx, w] = 1.0
    big = jnp.einsum("xvw,yxco->yvcwo", jnp.asarray(p), w_hwio.astype(jnp.float32))
    return big.reshape(kh, width * ci, width * co)


def prepare_params(params, x_shape):
    """One-time prep OUTSIDE the per-call path: folded per-tap conv weights,
    the per-channel group reduce+broadcast matrix (BN divisor folded in), and
    the packed BN affine vectors.  Conv biases are intentionally dropped: they
    cancel exactly under training-mode BatchNorm mean subtraction."""
    B, Cin, H, W = x_shape
    Cout = params["w1"].shape[-1]
    n_lane = W * Cout
    inv_count = 1.0 / float(B * H * W)                    # biased variance over (N,H,W)

    ch = np.arange(n_lane) % Cout                         # lane % Cout == channel
    gmat = jnp.asarray((ch[:, None] == ch[None, :]).astype(np.float32) * inv_count)

    bn = jnp.stack([jnp.tile(params["g1"], W),
                    jnp.tile(params["be1"], W),
                    jnp.tile(params["g2"], W),
                    jnp.tile(params["be2"], W)], axis=0).astype(jnp.float32)

    return {
        "w1f": _fold_conv_weights(params["w1"], W),       # (3, W*Cin,  W*Cout)
        "w2f": _fold_conv_weights(params["w2"], W),       # (3, W*Cout, W*Cout)
        "gmat": gmat,                                     # (W*Cout, W*Cout)
        "bn": bn,                                         # (4, W*Cout): g1,b1,g2,b2
    }


@jax.jit
def conv_block_forward(x_nchw, prep):
    """Full conv_block forward. Input/output are NCHW (PyTorch convention)."""
    B, Cin, H, W = x_nchw.shape
    n_lane = prep["bn"].shape[-1]
    Cout = n_lane // W
    n_rows = B * H

    # Layout plumbing on the small input: NCHW -> lane-packed rows (B*H, W*Cin).
    x_rows = jnp.transpose(x_nchw, (0, 2, 3, 1)).reshape(n_rows, W * Cin)
    x_rows = x_rows.astype(jnp.float32)

    def kernel(x_ref, w1_ref, w2_ref, gmat_ref, bn_ref, o_ref):
        # Row-within-image index -> boundary masks for the vertical halo.
        # (Tiny (B*H,1) iota only; the 128x128 gmat build is hoisted to the host.)
        h_idx = jax.lax.broadcasted_iota(jnp.int32, (n_rows, 1), 0) % H
        not_top = h_idx != 0
        not_bot = h_idx != (H - 1)
        gmat = gmat_ref[...]

        def conv3x3(x, w_ref):
            # Vertical taps as sublane rolls (+ boundary masks) -- no scratch
            # buffer, no unaligned slices.  Horizontal taps and horizontal
            # 'same' padding live in the folded weights.  Three per-tap MXU
            # dots accumulated in f32 vregs.
            up = jnp.where(not_top, pltpu.roll(x, shift=1, axis=0), 0.0)
            down = jnp.where(not_bot, pltpu.roll(x, shift=n_rows - 1, axis=0), 0.0)
            y = jnp.dot(up, w_ref[0], preferred_element_type=jnp.float32)
            y = y + jnp.dot(x, w_ref[1], preferred_element_type=jnp.float32)
            y = y + jnp.dot(down, w_ref[2], preferred_element_type=jnp.float32)
            return y

        def bn_relu(y, gamma, beta):
            # Fused one-pass BN stats: ONE (2, n_lane) x (n_lane, n_lane) dot
            # does the per-channel reduce+broadcast for sum and sum-of-squares
            # (breaks the mean->centered->var serial MXU/VPU dependency).
            stats = jnp.concatenate(
                [jnp.sum(y, axis=0, keepdims=True),
                 jnp.sum(y * y, axis=0, keepdims=True)], axis=0)
            red = jnp.dot(stats, gmat, preferred_element_type=jnp.float32)
            mean = red[0:1, :]
            var = red[1:2, :] - mean * mean        # biased variance (training BN)
            scale = gamma * jax.lax.rsqrt(var + EPS)
            return jnp.maximum((y - mean) * scale + beta, 0.0)

        # Stage 1 and stage 2; h1 stays entirely in vregs.
        h1 = bn_relu(conv3x3(x_ref[...], w1_ref), bn_ref[0:1, :], bn_ref[1:2, :])
        h2 = bn_relu(conv3x3(h1, w2_ref), bn_ref[2:3, :], bn_ref[3:4, :])

        # Lane-dense unmasked output store: (B*H, W*Cout) = (32, 128) here.
        o_ref[...] = h2.astype(o_ref.dtype)

    vmem = pl.BlockSpec(memory_space=pltpu.MemorySpace.VMEM)
    out2d = pl.pallas_call(
        kernel,
        out_shape=jax.ShapeDtypeStruct((n_rows, n_lane), jnp.float32),
        in_specs=[vmem] * 5,
        out_specs=vmem,
    )(x_rows, prep["w1f"], prep["w2f"], prep["gmat"], prep["bn"])

    # Back to PyTorch NCHW (layout plumbing on the small output).
    return jnp.transpose(out2d.reshape(B, H, W, Cout), (0, 3, 1, 2))


def init_params(key, in_c, out_c):
    """Deterministic synthetic init. Conv weights in HWIO; BN gamma=1, beta=0."""
    k1, k2, k3, k4 = jax.random.split(key, 4)
    return {
        "w1": 0.1 * jax.random.normal(k1, (3, 3, in_c, out_c), jnp.float32),
        "b1": 0.1 * jax.random.normal(k2, (out_c,), jnp.float32),
        "g1": jnp.ones((out_c,), jnp.float32),
        "be1": jnp.zeros((out_c,), jnp.float32),
        "w2": 0.1 * jax.random.normal(k3, (3, 3, out_c, out_c), jnp.float32),
        "b2": 0.1 * jax.random.normal(k4, (out_c,), jnp.float32),
        "g2": jnp.ones((out_c,), jnp.float32),
        "be2": jnp.zeros((out_c,), jnp.float32),
    }


def _reference_forward(x_nchw, params):
    """Pure-JAX (XLA) reference mirroring the PyTorch forward (incl. conv bias)."""
    def conv_bn_relu(x, w, b, g, be):
        y = jax.lax.conv_general_dilated(
            x, w, window_strides=(1, 1), padding="SAME",
            dimension_numbers=("NHWC", "HWIO", "NHWC"),
        ) + b.reshape(1, 1, 1, -1)
        mean = jnp.mean(y, axis=(0, 1, 2), keepdims=True)
        var = jnp.mean(jnp.square(y - mean), axis=(0, 1, 2), keepdims=True)
        y = (y - mean) * jax.lax.rsqrt(var + EPS)
        y = y * g.reshape(1, 1, 1, -1) + be.reshape(1, 1, 1, -1)
        return jnp.maximum(y, 0.0)

    x = jnp.transpose(x_nchw, (0, 2, 3, 1))
    x = conv_bn_relu(x, params["w1"], params["b1"], params["g1"], params["be1"])
    x = conv_bn_relu(x, params["w2"], params["b2"], params["g2"], params["be2"])
    return jnp.transpose(x, (0, 3, 1, 2))


if __name__ == "__main__":
    B, in_c, out_c, H, W = 2, 4, 8, 16, 16

    key = jax.random.PRNGKey(0)
    kx, kp = jax.random.split(key)
    x = jax.random.normal(kx, (B, in_c, H, W), jnp.float32)   # NCHW like PyTorch
    params = init_params(kp, in_c, out_c)

    prep = prepare_params(params, x.shape)                    # once, out of the hot path
    out = jax.block_until_ready(conv_block_forward(x, prep))

    ref = jax.block_until_ready(_reference_forward(x, params))
    assert out.shape == (B, out_c, H, W)
    np.testing.assert_allclose(np.asarray(out), np.asarray(ref), rtol=1e-4, atol=1e-4)

    print("KERNEL_OK")
</pallas_src>

<mosaic_0001>
module attributes {stable_mosaic.version = 11 : i64} {
  func.func @kernel(%arg0: memref<32x64xf32, #tpu.memory_space<vmem>>, %arg1: memref<3x64x128xf32, #tpu.memory_space<vmem>>, %arg2: memref<3x128x128xf32, #tpu.memory_space<vmem>>, %arg3: memref<128x128xf32, #tpu.memory_space<vmem>>, %arg4: memref<4x128xf32, #tpu.memory_space<vmem>>, %arg5: memref<32x128xf32, #tpu.memory_space<vmem>>) attributes {dimension_semantics = [], scalar_prefetch = 0 : i64, scratch_operands = 0 : i64, tpu.core_type = #tpu.core_type<tc>} {
    %0 = tpu.iota {dimensions = array<i32: 0>} : vector<32x1xi32>
    %c16_i32 = arith.constant 16 : i32
    %c0_i32 = arith.constant 0 : i32
    %1 = arith.cmpi eq, %c16_i32, %c0_i32 : i32
    %c1_i32 = arith.constant 1 : i32
    %2 = arith.select %1, %c1_i32, %c16_i32 : i32
    %3 = vector.broadcast %2 : i32 to vector<32x1xi32>
    %4 = arith.remsi %0, %3 : vector<32x1xi32>
    %c0_i32_0 = arith.constant 0 : i32
    %5 = vector.broadcast %c0_i32_0 : i32 to vector<32x1xi32>
    %6 = arith.cmpi ne, %4, %5 : vector<32x1xi32>
    %c0_i32_1 = arith.constant 0 : i32
    %7 = vector.broadcast %c0_i32_1 : i32 to vector<32x1xi32>
    %8 = arith.cmpi slt, %4, %7 : vector<32x1xi32>
    %c0_i32_2 = arith.constant 0 : i32
    %9 = arith.cmpi slt, %2, %c0_i32_2 : i32
    %10 = vector.broadcast %9 : i1 to vector<32x1xi1>
    %11 = vector.broadcast %10 : vector<32x1xi1> to vector<32x1xi1>
    %12 = arith.xori %8, %11 : vector<32x1xi1>
    %13 = arith.andi %12, %6 : vector<32x1xi1>
    %14 = vector.broadcast %2 : i32 to vector<32x1xi32>
    %15 = arith.addi %4, %14 : vector<32x1xi32>
    %16 = arith.select %13, %15, %4 : vector<32x1xi1>, vector<32x1xi32>
    %c0_i32_3 = arith.constant 0 : i32
    %17 = vector.broadcast %c0_i32_3 : i32 to vector<32x1xi32>
    %18 = arith.cmpi ne, %16, %17 : vector<32x1xi32>
    %c15_i32 = arith.constant 15 : i32
    %19 = vector.broadcast %c15_i32 : i32 to vector<32x1xi32>
    %20 = arith.cmpi ne, %16, %19 : vector<32x1xi32>
    %c0 = arith.constant 0 : index
    %c0_4 = arith.constant 0 : index
    %21 = vector.load %arg3[%c0, %c0_4] : memref<128x128xf32, #tpu.memory_space<vmem>>, vector<128x128xf32>
    %c0_5 = arith.constant 0 : index
    %c0_6 = arith.constant 0 : index
    %22 = vector.load %arg0[%c0_5, %c0_6] : memref<32x64xf32, #tpu.memory_space<vmem>>, vector<32x64xf32>
    %c1_i32_7 = arith.constant 1 : i32
    %23 = tpu.dynamic_rotate %22 by %c1_i32_7 dim 0 : vector<32x64xf32>, i32 -> vector<32x64xf32>
    %cst = arith.constant 0.000000e+00 : f32
    %24 = vector.shape_cast %18 : vector<32x1xi1> to vector<32x1xi1>
    %25 = vector.broadcast %24 : vector<32x1xi1> to vector<32x64xi1>
    %26 = vector.broadcast %cst : f32 to vector<32x64xf32>
    %27 = arith.select %25, %23, %26 : vector<32x64xi1>, vector<32x64xf32>
    %c31_i32 = arith.constant 31 : i32
    %28 = tpu.dynamic_rotate %22 by %c31_i32 dim 0 : vector<32x64xf32>, i32 -> vector<32x64xf32>
    %cst_8 = arith.constant 0.000000e+00 : f32
    %29 = vector.shape_cast %20 : vector<32x1xi1> to vector<32x1xi1>
    %30 = vector.broadcast %29 : vector<32x1xi1> to vector<32x64xi1>
    %31 = vector.broadcast %cst_8 : f32 to vector<32x64xf32>
    %32 = arith.select %30, %28, %31 : vector<32x64xi1>, vector<32x64xf32>
    %c0_9 = arith.constant 0 : index
    %c0_10 = arith.constant 0 : index
    %c0_11 = arith.constant 0 : index
    %33 = vector.load %arg1[%c0_9, %c0_10, %c0_11] : memref<3x64x128xf32, #tpu.memory_space<vmem>>, vector<1x64x128xf32>
    %34 = vector.shape_cast %33 : vector<1x64x128xf32> to vector<64x128xf32>
    %cst_12 = arith.constant dense<0.000000e+00> : vector<32x128xf32>
    %35 = tpu.matmul %27, %34, %cst_12 {dimension_numbers = #tpu.dot_dimension_numbers<[1], [0], [0], [1], [0, 0, 1, 1], [], []>} : vector<32x64xf32>, vector<64x128xf32>, vector<32x128xf32> -> vector<32x128xf32>
    %c1 = arith.constant 1 : index
    %c0_13 = arith.constant 0 : index
    %c0_14 = arith.constant 0 : index
    %36 = vector.load %arg1[%c1, %c0_13, %c0_14] : memref<3x64x128xf32, #tpu.memory_space<vmem>>, vector<1x64x128xf32>
    %37 = vector.shape_cast %36 : vector<1x64x128xf32> to vector<64x128xf32>
    %cst_15 = arith.constant dense<0.000000e+00> : vector<32x128xf32>
    %38 = tpu.matmul %22, %37, %cst_15 {dimension_numbers = #tpu.dot_dimension_numbers<[1], [0], [0], [1], [0, 0, 1, 1], [], []>} : vector<32x64xf32>, vector<64x128xf32>, vector<32x128xf32> -> vector<32x128xf32>
    %39 = arith.addf %35, %38 : vector<32x128xf32>
    %c2 = arith.constant 2 : index
    %c0_16 = arith.constant 0 : index
    %c0_17 = arith.constant 0 : index
    %40 = vector.load %arg1[%c2, %c0_16, %c0_17] : memref<3x64x128xf32, #tpu.memory_space<vmem>>, vector<1x64x128xf32>
    %41 = vector.shape_cast %40 : vector<1x64x128xf32> to vector<64x128xf32>
    %cst_18 = arith.constant dense<0.000000e+00> : vector<32x128xf32>
    %42 = tpu.matmul %32, %41, %cst_18 {dimension_numbers = #tpu.dot_dimension_numbers<[1], [0], [0], [1], [0, 0, 1, 1], [], []>} : vector<32x64xf32>, vector<64x128xf32>, vector<32x128xf32> -> vector<32x128xf32>
    %43 = arith.addf %39, %42 : vector<32x128xf32>
    %c0_19 = arith.constant 0 : index
    %c0_20 = arith.constant 0 : index
    %44 = vector.load %arg4[%c0_19, %c0_20] : memref<4x128xf32, #tpu.memory_space<vmem>>, vector<1x128xf32>
    %c1_21 = arith.constant 1 : index
    %c0_22 = arith.constant 0 : index
    %45 = vector.load %arg4[%c1_21, %c0_22] : memref<4x128xf32, #tpu.memory_space<vmem>>, vector<1x128xf32>
    %cst_23 = arith.constant dense<0.000000e+00> : vector<128xf32>
    %46 = vector.multi_reduction <add>, %43, %cst_23 [0] : vector<32x128xf32> to vector<128xf32>
    %47 = vector.shape_cast %46 : vector<128xf32> to vector<1x128xf32>
    %48 = arith.mulf %43, %43 : vector<32x128xf32>
    %cst_24 = arith.constant dense<0.000000e+00> : vector<128xf32>
    %49 = vector.multi_reduction <add>, %48, %cst_24 [0] : vector<32x128xf32> to vector<128xf32>
    %50 = vector.shape_cast %49 : vector<128xf32> to vector<1x128xf32>
    %51 = tpu.concatenate %47, %50 in 0 : vector<1x128xf32>, vector<1x128xf32> -> vector<2x128xf32>
    %cst_25 = arith.constant dense<0.000000e+00> : vector<2x128xf32>
    %52 = tpu.matmul %51, %21, %cst_25 {dimension_numbers = #tpu.dot_dimension_numbers<[1], [0], [0], [1], [0, 0, 1, 1], [], []>} : vector<2x128xf32>, vector<128x128xf32>, vector<2x128xf32> -> vector<2x128xf32>
    %53 = vector.extract_strided_slice %52 {offsets = [0, 0], sizes = [1, 128], strides = [1, 1]} : vector<2x128xf32> to vector<1x128xf32>
    %54 = vector.extract_strided_slice %52 {offsets = [1, 0], sizes = [1, 128], strides = [1, 1]} : vector<2x128xf32> to vector<1x128xf32>
    %55 = arith.mulf %53, %53 : vector<1x128xf32>
    %56 = arith.subf %54, %55 : vector<1x128xf32>
    %cst_26 = arith.constant 9.99999974E-6 : f32
    %57 = vector.broadcast %cst_26 : f32 to vector<1x128xf32>
    %58 = arith.addf %56, %57 : vector<1x128xf32>
    %59 = math.rsqrt %58 : vector<1x128xf32>
    %60 = arith.mulf %44, %59 : vector<1x128xf32>
    %61 = vector.broadcast %53 : vector<1x128xf32> to vector<32x128xf32>
    %62 = arith.subf %43, %61 : vector<32x128xf32>
    %63 = vector.broadcast %60 : vector<1x128xf32> to vector<32x128xf32>
    %64 = arith.mulf %62, %63 : vector<32x128xf32>
    %65 = vector.broadcast %45 : vector<1x128xf32> to vector<32x128xf32>
    %66 = arith.addf %64, %65 : vector<32x128xf32>
    %cst_27 = arith.constant 0.000000e+00 : f32
    %67 = vector.broadcast %cst_27 : f32 to vector<32x128xf32>
    %68 = arith.maximumf %66, %67 : vector<32x128xf32>
    %c1_i32_28 = arith.constant 1 : i32
    %69 = tpu.dynamic_rotate %68 by %c1_i32_28 dim 0 : vector<32x128xf32>, i32 -> vector<32x128xf32>
    %cst_29 = arith.constant 0.000000e+00 : f32
    %70 = vector.shape_cast %18 : vector<32x1xi1> to vector<32x1xi1>
    %71 = vector.broadcast %70 : vector<32x1xi1> to vector<32x128xi1>
    %72 = vector.broadcast %cst_29 : f32 to vector<32x128xf32>
    %73 = arith.select %71, %69, %72 : vector<32x128xi1>, vector<32x128xf32>
    %c31_i32_30 = arith.constant 31 : i32
    %74 = tpu.dynamic_rotate %68 by %c31_i32_30 dim 0 : vector<32x128xf32>, i32 -> vector<32x128xf32>
    %cst_31 = arith.constant 0.000000e+00 : f32
    %75 = vector.shape_cast %20 : vector<32x1xi1> to vector<32x1xi1>
    %76 = vector.broadcast %75 : vector<32x1xi1> to vector<32x128xi1>
    %77 = vector.broadcast %cst_31 : f32 to vector<32x128xf32>
    %78 = arith.select %76, %74, %77 : vector<32x128xi1>, vector<32x128xf32>
    %c0_32 = arith.constant 0 : index
    %c0_33 = arith.constant 0 : index
    %c0_34 = arith.constant 0 : index
    %79 = vector.load %arg2[%c0_32, %c0_33, %c0_34] : memref<3x128x128xf32, #tpu.memory_space<vmem>>, vector<1x128x128xf32>
    %80 = vector.shape_cast %79 : vector<1x128x128xf32> to vector<128x128xf32>
    %cst_35 = arith.constant dense<0.000000e+00> : vector<32x128xf32>
    %81 = tpu.matmul %73, %80, %cst_35 {dimension_numbers = #tpu.dot_dimension_numbers<[1], [0], [0], [1], [0, 0, 1, 1], [], []>} : vector<32x128xf32>, vector<128x128xf32>, vector<32x128xf32> -> vector<32x128xf32>
    %c1_36 = arith.constant 1 : index
    %c0_37 = arith.constant 0 : index
    %c0_38 = arith.constant 0 : index
    %82 = vector.load %arg2[%c1_36, %c0_37, %c0_38] : memref<3x128x128xf32, #tpu.memory_space<vmem>>, vector<1x128x128xf32>
    %83 = vector.shape_cast %82 : vector<1x128x128xf32> to vector<128x128xf32>
    %cst_39 = arith.constant dense<0.000000e+00> : vector<32x128xf32>
    %84 = tpu.matmul %68, %83, %cst_39 {dimension_numbers = #tpu.dot_dimension_numbers<[1], [0], [0], [1], [0, 0, 1, 1], [], []>} : vector<32x128xf32>, vector<128x128xf32>, vector<32x128xf32> -> vector<32x128xf32>
    %85 = arith.addf %81, %84 : vector<32x128xf32>
    %c2_40 = arith.constant 2 : index
    %c0_41 = arith.constant 0 : index
    %c0_42 = arith.constant 0 : index
    %86 = vector.load %arg2[%c2_40, %c0_41, %c0_42] : memref<3x128x128xf32, #tpu.memory_space<vmem>>, vector<1x128x128xf32>
    %87 = vector.shape_cast %86 : vector<1x128x128xf32> to vector<128x128xf32>
    %cst_43 = arith.constant dense<0.000000e+00> : vector<32x128xf32>
    %88 = tpu.matmul %78, %87, %cst_43 {dimension_numbers = #tpu.dot_dimension_numbers<[1], [0], [0], [1], [0, 0, 1, 1], [], []>} : vector<32x128xf32>, vector<128x128xf32>, vector<32x128xf32> -> vector<32x128xf32>
    %89 = arith.addf %85, %88 : vector<32x128xf32>
    %c2_44 = arith.constant 2 : index
    %c0_45 = arith.constant 0 : index
    %90 = vector.load %arg4[%c2_44, %c0_45] : memref<4x128xf32, #tpu.memory_space<vmem>>, vector<1x128xf32>
    %c3 = arith.constant 3 : index
    %c0_46 = arith.constant 0 : index
    %91 = vector.load %arg4[%c3, %c0_46] : memref<4x128xf32, #tpu.memory_space<vmem>>, vector<1x128xf32>
    %cst_47 = arith.constant dense<0.000000e+00> : vector<128xf32>
    %92 = vector.multi_reduction <add>, %89, %cst_47 [0] : vector<32x128xf32> to vector<128xf32>
    %93 = vector.shape_cast %92 : vector<128xf32> to vector<1x128xf32>
    %94 = arith.mulf %89, %89 : vector<32x128xf32>
    %cst_48 = arith.constant dense<0.000000e+00> : vector<128xf32>
    %95 = vector.multi_reduction <add>, %94, %cst_48 [0] : vector<32x128xf32> to vector<128xf32>
    %96 = vector.shape_cast %95 : vector<128xf32> to vector<1x128xf32>
    %97 = tpu.concatenate %93, %96 in 0 : vector<1x128xf32>, vector<1x128xf32> -> vector<2x128xf32>
    %cst_49 = arith.constant dense<0.000000e+00> : vector<2x128xf32>
    %98 = tpu.matmul %97, %21, %cst_49 {dimension_numbers = #tpu.dot_dimension_numbers<[1], [0], [0], [1], [0, 0, 1, 1], [], []>} : vector<2x128xf32>, vector<128x128xf32>, vector<2x128xf32> -> vector<2x128xf32>
    %99 = vector.extract_strided_slice %98 {offsets = [0, 0], sizes = [1, 128], strides = [1, 1]} : vector<2x128xf32> to vector<1x128xf32>
    %100 = vector.extract_strided_slice %98 {offsets = [1, 0], sizes = [1, 128], strides = [1, 1]} : vector<2x128xf32> to vector<1x128xf32>
    %101 = arith.mulf %99, %99 : vector<1x128xf32>
    %102 = arith.subf %100, %101 : vector<1x128xf32>
    %cst_50 = arith.constant 9.99999974E-6 : f32
    %103 = vector.broadcast %cst_50 : f32 to vector<1x128xf32>
    %104 = arith.addf %102, %103 : vector<1x128xf32>
    %105 = math.rsqrt %104 : vector<1x128xf32>
    %106 = arith.mulf %90, %105 : vector<1x128xf32>
    %107 = vector.broadcast %99 : vector<1x128xf32> to vector<32x128xf32>
    %108 = arith.subf %89, %107 : vector<32x128xf32>
    %109 = vector.broadcast %106 : vector<1x128xf32> to vector<32x128xf32>
    %110 = arith.mulf %108, %109 : vector<32x128xf32>
    %111 = vector.broadcast %91 : vector<1x128xf32> to vector<32x128xf32>
    %112 = arith.addf %110, %111 : vector<32x128xf32>
    %cst_51 = arith.constant 0.000000e+00 : f32
    %113 = vector.broadcast %cst_51 : f32 to vector<32x128xf32>
    %114 = arith.maximumf %112, %113 : vector<32x128xf32>
    %c0_52 = arith.constant 0 : index
    %c0_53 = arith.constant 0 : index
    %115 = vector.load %arg5[%c0_52, %c0_53] : memref<32x128xf32, #tpu.memory_space<vmem>>, vector<32x128xf32>
    tpu.vector_store %arg5[%c0_52, %c0_53], %114 {strides = array<i32>} : memref<32x128xf32, #tpu.memory_space<vmem>>, vector<32x128xf32>,
    return
  }
}

</mosaic_0001>

<bundles_post_ra>
// kernel: conv_block_forward.1
= control target key start
LH: loop header
LB: loop body
LE: loop exit
PB: predicated region body
PF: predicated region fallthrough
CT: control target
= control target key end

     0   :  { %10 = vsyncpa [#allocation3], 0  ;;  %s1551_s18 = smov [#allocation2]   ;;  %s2082_s0 = inlined_call_operand.vmem [shape: f32[32,64], index: 0, kind: input, shape index: {}]   ;;  %s2083_s1 = inlined_call_operand.hbm [shape: f32[3,64,128], index: 1, kind: input, shape index: {}]   ;;  %s2084_s2 = inlined_call_operand.vmem [shape: f32[3,128,128], index: 2, kind: input, shape index: {}]   ;;  %s2085_s3 = inlined_call_operand.vmem [shape: f32[128,128], index: 3, kind: input, shape index: {}]   ;;  %s2086_s4 = inlined_call_operand.vmem [shape: f32[4,128], index: 4, kind: input, shape index: {}]   ;;  %s2087_s5 = inlined_call_operand.vmem [shape: f32[32,128], index: 5, kind: output, shape index: {}]  }
   0x1   :  { %s18_s19 = sshll.u32 %s1551_s18, 4  ;;  %s19_s19 = int_to_ptr.vmem [resolvable:$true] %s18_s19 }
   0x2   :  { %s1537_s20 = scalar_lea.vmem %s19_s19, 3072  ;;  %p1542_p1 = scmp.lt.s32.totalorder %s19_s19, %s19_s19 }
   0x3   :  { %p1538_p0 = scmp.ne.s32.totalorder %s19_s19, %s1537_s20  ;;  %p1543_p2 = scmp.lt.s32.totalorder %s1537_s20, %s1537_s20 }
   0x5   :  { %p1544_p3 = por %p1543_p2, %p1542_p1 }
   0x7   :  { %p1545_p4 = pnand %p1544_p3, %p1538_p0 }
   0x9   :  { %1548 = shalt.err (!%p1545_p4)
}
   0xa   :  { %s1552_s21 = smov 128   ;;  %s1553_s22 = smov 8  }
   0xb   :  { %24 = dma.hbm_to_vmem [thread:$0]  %s2083_s1, 3072, %s19_s19, [#allocation3], %s1552_s21, %s1552_s21, %s1553_s22  }
   0xc   :  { %1549 = dma.done.wait [#allocation3], 3072  }
   0xd   :  { %1550 = vsyncadd [#allocation3], 4294964224  ;;  %v34_v0 = vlaneseq  ;;  %v173_v1 = vld [vmem:[#allocation2 + $0x78] sm:$0xff]  ;;  %v172_v3 = vld [vmem:[#allocation2 + $0x70] sm:$0xff]  ;;  %vm174_vm2 = vcmask 523264   ;;  %v1554_v62 = vmov 0.0  }
   0xe   :  { %v164_v2 = vld [vmem:[#allocation2 + $0x38] sm:$0xff]  ;;  %1270 = vmatprep.subr.mxu0 %v173_v1  ;;  %v163_v4 = vld [vmem:[#allocation2 + $0x30] sm:$0xff]  ;;  %v171_v5 = vld [vmem:[#allocation2 + $0x68] sm:$0xff]  ;;  %vm1555_vm7 = vmmov 0   ;;  %vm503_vm8 = vcmask 1040384  }
   0xf   :  { %1292 = vmatprep.subr.mxu1 %v164_v2  ;;  %1271 = vmatpush3.msra.mxu0 %v173_v1  ;;  %v162_v6 = vld [vmem:[#allocation2 + $0x28] sm:$0xff]  ;;  %v1589_v7 = vshrl.u32 %v34_v0, 7  ;;  %v170_v8 = vld [vmem:[#allocation2 + $0x60] sm:$0xff]  ;;  %v1599_v11 = vld [vmem:[%s2082_s0 + $0x18] sm:$0xff] }
  0x10   :  { %1293 = vmatpush3.msra.mxu1 %v164_v2  ;;  %1272 = vmatprep.subr.mxu0 %v172_v3  ;;  %v161_v9 = vld [vmem:[#allocation2 + $0x20] sm:$0xff]  ;;  %v169_v12 = vld [vmem:[#allocation2 + $0x58] sm:$0xff]  ;;  %v168_v15 = vld [vmem:[#allocation2 + $0x50] sm:$0xff]  ;;  %v118_v18 = vrot.slane %v1599_v11, 7  ;;  %v139_v53 = vrot.slane %v1599_v11, 1 }
  0x11   :  { %1294 = vmatprep.subr.mxu1 %v163_v4  ;;  %1273 = vmatpush3.msra.mxu0 %v172_v3  ;;  %v1594_v10 = vld [vmem:[%s2082_s0] sm:$0xff]  ;;  %v160_v13 = vld [vmem:[#allocation2 + $0x18] sm:$0xff]  ;;  %v37_v14 = vadd.s32 16, %v1589_v7  ;;  %v43_v17 = vand.u32 15, %v1589_v7  ;;  %v159_v19 = vld [vmem:[#allocation2 + $0x10] sm:$0xff]  ;;  %vm119_vm0 = vcmp.lt.s32.totalorder %v1589_v7, 1 }
  0x12   :  { %1295 = vmatpush3.msra.mxu1 %v163_v4  ;;  %1274 = vmatprep.subr.mxu0 %v171_v5  ;;  %v115_v16 = vrot.slane %v1594_v10, 7  ;;  %v1609_v20 = vld [vmem:[%s2082_s0 + $0x8] sm:$0xff]  ;;  %v1614_v21 = vld [vmem:[%s2082_s0 + $0x10] sm:$0xff]  ;;  %v166_v29 = vld [vmem:[#allocation2 + $0x40] sm:$0xff]  ;;  %v136_v36 = vrot.slane %v1594_v10, 1  ;;  %vm140_vm4 = vcmp.lt.s32.totalorder %v1589_v7, 7 }
  0x13   :  { %1296 = vmatprep.subr.mxu1 %v162_v6  ;;  %1275 = vmatpush3.msra.mxu0 %v171_v5  ;;  %v167_v22 = vld [vmem:[#allocation2 + $0x48] sm:$0xff]  ;;  %v117_v24 = vrot.slane %v1614_v21, 7  ;;  %v57_v25 = vand.u32 15, %v37_v14  ;;  %vm1617_vm1 = vcmp.ne.s32.totalorder %v43_v17, 0  ;;  %v116_v28 = vrot.slane %v1609_v20, 7  ;;  %v157_v30 = vld [vmem:[#allocation2] sm:$0xff] }
  0x14   :  { %1297 = vmatpush3.msra.mxu1 %v162_v6  ;;  %1276 = vmatprep.subr.mxu0 %v170_v8  ;;  %v158_v23 = vld [vmem:[#allocation2 + $0x8] sm:$0xff]  ;;  %v123_v27 = vsel %vm119_vm0, %v118_v18, %v115_v16  ;;  %v377_v35 = vld [vmem:[#allocation2 + $0xb8] sm:$0xff]  ;;  %v137_v37 = vrot.slane %v1609_v20, 1  ;;  %v376_v39 = vld [vmem:[#allocation2 + $0xb0] sm:$0xff]  ;;  %v36_v43 = vadd.s32 8, %v1589_v7  ;;  %v138_v46 = vrot.slane %v1614_v21, 1 }
  0x15   :  { %1298 = vmatprep.subr.mxu1 %v161_v9  ;;  %1277 = vmatpush3.msra.mxu0 %v170_v8  ;;  %v132_v31 = vsel %vm1617_vm1, %v123_v27, 0.0  ;;  %vm1626_vm3 = vcmp.ne.s32.totalorder %v57_v25, 0  ;;  %v121_v33 = vsel %vm119_vm0, %v116_v28, %v117_v24  ;;  %v122_v34 = vsel %vm119_vm0, %v115_v16, %v116_v28  ;;  %v375_v41 = vld [vmem:[#allocation2 + $0xa8] sm:$0xff]  ;;  %v374_v44 = vld [vmem:[#allocation2 + $0xa0] sm:$0xff]  ;;  %v373_v45 = vld [vmem:[#allocation2 + $0x98] sm:$0xff] }
  0x16   :  { %1299 = vmatpush3.msra.mxu1 %v161_v9  ;;  %1278 = vmatprep.subr.mxu0 %v169_v12  ;;  %v134_v38 = vsel %vm1626_vm3, %v121_v33, 0.0  ;;  %v120_v40 = vsel %vm119_vm0, %v117_v24, %v118_v18  ;;  %v143_v42 = vsel %vm140_vm4, %v136_v36, %v137_v37  ;;  %v50_v47 = vand.u32 15, %v36_v43  ;;  %v372_v49 = vld [vmem:[#allocation2 + $0x90] sm:$0xff]  ;;  %v371_v50 = vld [vmem:[#allocation2 + $0x88] sm:$0xff]  ;;  %v370_v55 = vld [vmem:[#allocation2 + $0x80] sm:$0xff] }
  0x17   :  { %1300 = vmatprep.subr.mxu1 %v160_v13  ;;  %1279 = vmatpush3.msra.mxu0 %v169_v12  ;;  %v38_v48 = vadd.s32 24, %v1589_v7  ;;  %v142_v52 = vsel %vm140_vm4, %v137_v37, %v138_v46  ;;  %v141_v57 = vsel %vm140_vm4, %v138_v46, %v139_v53  ;;  %v144_v59 = vsel %vm140_vm4, %v139_v53, %v136_v36  ;;  %v1684_v61 = vld [vmem:[%s2085_s3 + $0x78] sm:$0xff]  ;;  %v1690_v63 = vld [vmem:[%s2085_s3 + $0x70] sm:$0xff]  ;;  %v1699_v0 = vld [vmem:[%s2085_s3 + $0x68] sm:$0xff] }
  0x18   :  { %1301 = vmatpush3.msra.mxu1 %v160_v13  ;;  %1280 = vmatprep.subr.mxu0 %v168_v15  ;;  %vm1659_vm5 = vcmp.ne.s32.totalorder %v50_v47, 15  ;;  %v1706_v1 = vld [vmem:[%s2085_s3 + $0x60] sm:$0xff]  ;;  %v1713_v2 = vld [vmem:[%s2085_s3 + $0x58] sm:$0xff]  ;;  %v1720_v3 = vld [vmem:[%s2085_s3 + $0x50] sm:$0xff] }
  0x19   :  { %1302 = vmatprep.subr.mxu1 %v159_v19  ;;  %1281 = vmatpush3.msra.mxu0 %v168_v15  ;;  %v64_v54 = vand.u32 15, %v38_v48  ;;  %v154_v56 = vsel %vm1659_vm5, %v142_v52, 0.0  ;;  %v1727_v4 = vld [vmem:[%s2085_s3 + $0x48] sm:$0xff]  ;;  %v1734_v5 = vld [vmem:[%s2085_s3 + $0x40] sm:$0xff]  ;;  %v1741_v6 = vld [vmem:[%s2085_s3 + $0x38] sm:$0xff] }
  0x1a   :  { %1303 = vmatpush3.msra.mxu1 %v159_v19  ;;  %1282 = vmatprep.subr.mxu0 %v167_v22  ;;  %v1748_v8 = vld [vmem:[%s2085_s3 + $0x30] sm:$0xff]  ;;  %v1755_v9 = vld [vmem:[%s2085_s3 + $0x28] sm:$0xff]  ;;  %v1790_v14 = vld [vmem:[%s2085_s3] sm:$0xff] }
  0x1b   :  { %1304 = vmatprep.subr.mxu1 %v158_v23  ;;  %1283 = vmatpush3.msra.mxu0 %v167_v22  ;;  %vm1670_vm6 = vcmp.ne.s32.totalorder %v64_v54, 15  ;;  %v1774_v12 = vld [vmem:[%s2085_s3 + $0x10] sm:$0xff]  ;;  %v1783_v13 = vld [vmem:[%s2085_s3 + $0x8] sm:$0xff] }
  0x1c   :  { %1305 = vmatpush3.msra.mxu1 %v158_v23  ;;  %1284 = vmatprep.subr.mxu0 %v166_v29  ;;  %v156_v60 = vsel %vm1670_vm6, %v144_v59, 0.0  ;;  %v1131_v32 = vld [vmem:[%s2084_s2 + $0x150] sm:$0xff] }
  0x1d   :  { %1306 = vmatprep.subr.mxu1 %v157_v30  ;;  %1285 = vmatpush3.msra.mxu0 %v166_v29 }
  0x1e   :  { %1286 = vmatprep.mubr.msk.f32.mxu0 %vm174_vm2, %v1594_v10  ;;  %1307 = vmatpush3.msra.mxu1 %v157_v30  ;;  %v1762_v10 = vld [vmem:[%s2085_s3 + $0x20] sm:$0xff] }
  0x1f   :  { %1308 = vmatprep.mubr.msk.f32.mxu1 %vm174_vm2, %v132_v31  ;;  %1287 = vmatmul.mubr.msk.f32.vlgmr.msra.gmra.mxu0 %vm174_vm2, %v1609_v20 }
  0x20   :  { %1309 = vmatmul.mubr.msk.f32.vlgmr.msra.gmra.mxu1 %vm174_vm2, %v122_v34  ;;  %1314 = vmatprep.subr.mxu0 %v377_v35 }
  0x21   :  { %1289 = vmatprep.mubr.msk.f32.mxu0 %vm174_vm2, %v1614_v21  ;;  %1315 = vmatpush3.msra.mxu0 %v377_v35 }
  0x22   :  { %1311 = vmatprep.mubr.msk.f32.mxu1 %vm174_vm2, %v134_v38  ;;  %1316 = vmatprep.subr.mxu0 %v376_v39 }
  0x23   :  { %1317 = vmatpush3.msra.mxu0 %v376_v39  ;;  %1336 = vmatprep.subr.mxu1 %v1554_v62 }
  0x24   :  { %1312 = vmatmul.mubr.msk.f32.gmra.mxu1 %vm174_vm2, %v120_v40  ;;  %1318 = vmatprep.subr.mxu0 %v375_v41 }
  0x25   :  { %1290 = vmatmul.mubr.msk.f32.gmra.mxu0 %vm174_vm2, %v1599_v11  ;;  %1337 = vmatpush3.msra.mxu1 %v1684_v61  ;;  %v1768_v11 = vld [vmem:[%s2085_s3 + $0x18] sm:$0xff] }
  0x26   :  { %1319 = vmatpush3.msra.mxu0 %v375_v41  ;;  %1330 = vmatprep.mubr.msk.f32.mxu0 %vm174_vm2, %v143_v42 }
  0x27   :  { %1320 = vmatprep.subr.mxu0 %v374_v44  ;;  %1338 = vmatprep.subr.mxu1 %v1554_v62 }
  0x28   :  { %1321 = vmatpush3.msra.mxu0 %v374_v44  ;;  %1339 = vmatpush3.msra.mxu1 %v1690_v63 }
  0x29   :  { %1322 = vmatprep.subr.mxu0 %v373_v45  ;;  %1340 = vmatprep.subr.mxu1 %v1554_v62 }
  0x2a   :  { %1323 = vmatpush3.msra.mxu0 %v373_v45  ;;  %1341 = vmatpush3.msra.mxu1 %v1699_v0 }
  0x2b   :  { %1324 = vmatprep.subr.mxu0 %v372_v49  ;;  %1342 = vmatprep.subr.mxu1 %v1554_v62 }
  0x2c   :  { %1325 = vmatpush3.msra.mxu0 %v372_v49  ;;  %1343 = vmatpush3.msra.mxu1 %v1706_v1 }
  0x2d   :  { %1326 = vmatprep.subr.mxu0 %v371_v50  ;;  %1344 = vmatprep.subr.mxu1 %v1554_v62 }
  0x2e   :  { %1327 = vmatpush3.msra.mxu0 %v371_v50  ;;  %1345 = vmatpush3.msra.mxu1 %v1713_v2 }
  0x2f   :  { %1328 = vmatprep.subr.mxu0 %v370_v55  ;;  %1346 = vmatprep.subr.mxu1 %v1554_v62 }
  0x30   :  { %1329 = vmatpush3.msra.mxu0 %v370_v55  ;;  %1347 = vmatpush3.msra.mxu1 %v1720_v3 }
  0x31   :  { %1331 = vmatmul.mubr.msk.f32.vlgmr.msra.gmra.mxu0 %vm174_vm2, %v154_v56  ;;  %1348 = vmatprep.subr.mxu1 %v1554_v62 }
  0x32   :  { %1333 = vmatprep.mubr.msk.f32.mxu0 %vm174_vm2, %v141_v57  ;;  %1349 = vmatpush3.msra.mxu1 %v1727_v4 }
  0x33   :  { %1350 = vmatprep.subr.mxu1 %v1554_v62  ;;  %1368 = vmatprep.mubr.msk.f32.mxu1 %vm1555_vm7, %v1554_v62 }
  0x34   :  { %1351 = vmatpush3.msra.mxu1 %v1734_v5 }
  0x35   :  { %1334 = vmatmul.mubr.msk.f32.gmra.mxu0 %vm174_vm2, %v156_v60  ;;  %1352 = vmatprep.subr.mxu1 %v1554_v62 }
  0x36   :  { %1353 = vmatpush3.msra.mxu1 %v1741_v6 }
  0x37   :  { %1354 = vmatprep.subr.mxu1 %v1554_v62 }
  0x38   :  { %1355 = vmatpush3.msra.mxu1 %v1748_v8 }
  0x39   :  { %1356 = vmatprep.subr.mxu1 %v1554_v62 }
  0x3a   :  { %1357 = vmatpush3.msra.mxu1 %v1755_v9 }
  0x3b   :  { %1358 = vmatprep.subr.mxu1 %v1554_v62 }
  0x3c   :  { %1359 = vmatpush3.msra.mxu1 %v1762_v10 }
  0x3d   :  { %1360 = vmatprep.subr.mxu1 %v1554_v62 }
  0x3e   :  { %1361 = vmatpush3.msra.mxu1 %v1768_v11 }
  0x3f   :  { %1362 = vmatprep.subr.mxu1 %v1554_v62 }
  0x40   :  { %1363 = vmatpush3.msra.mxu1 %v1774_v12 }
  0x41   :  { %1364 = vmatprep.subr.mxu1 %v1554_v62 }
  0x42   :  { %1365 = vmatpush3.msra.mxu1 %v1783_v13 }
  0x43   :  { %1366 = vmatprep.subr.mxu1 %v1554_v62 }
  0x44   :  { %1367 = vmatpush3.msra.mxu1 %v1790_v14 }
  0xdf   :  { %v1288_v15 = vpop.f32.mrf.mxu0 }
  0xe0   :  { %v1310_v16 = vpop.f32.mrf.mxu1 }
  0xe1   :  { %v253_v17 = vpop.f32.mrf.mxu0  ;;  %v356_v23 = vadd.f32 %v1310_v16, %v1288_v15  ;;  %v1118_v16 = vld [vmem:[%s2084_s2 + $0xf8] sm:$0xff] }
  0xe2   :  { %v350_v19 = vpop.f32.mrf.mxu1  ;;  %1371 = vmatprep.subr.mxu0 %v1118_v16 }
  0xe3   :  { %v351_v24 = vadd.f32 %v350_v19, %v253_v17  ;;  %1372 = vmatpush3.msra.mxu0 %v1118_v16  ;;  %v1117_v17 = vld [vmem:[%s2084_s2 + $0xf0] sm:$0xff]  ;;  %v653_v19 = vld [vmem:[%s2084_s2 + $0x78] sm:$0xff] }
  0xe4   :  { %v1313_v20 = vpop.f32.mrf.mxu1  ;;  %1373 = vmatprep.subr.mxu0 %v1117_v17  ;;  %1409 = vmatprep.subr.mxu1 %v653_v19 }
  0xe5   :  { %v1291_v18 = vpop.f32.mrf.mxu0  ;;  %1374 = vmatpush3.msra.mxu0 %v1117_v17  ;;  %v1917_v17 = vsub.s32 0, %v1589_v7 }
  0xe6   :  { %v360_v25 = vpop.f32.mrf.mxu1  ;;  %v366_v31 = vadd.f32 %v1313_v20, %v1291_v18  ;;  %v1116_v18 = vld [vmem:[%s2084_s2 + $0xe8] sm:$0xff]  ;;  %v1115_v20 = vld [vmem:[%s2084_s2 + $0xe0] sm:$0xff] }
  0xe7   :  { %v263_v21 = vpop.f32.mrf.mxu0  ;;  %1375 = vmatprep.subr.mxu0 %v1116_v18 }
  0xe8   :  { %v361_v33 = vadd.f32 %v360_v25, %v263_v21  ;;  %1376 = vmatpush3.msra.mxu0 %v1116_v18  ;;  %v652_v21 = vld [vmem:[%s2084_s2 + $0x70] sm:$0xff]  ;;  %v650_v25 = vld [vmem:[%s2084_s2 + $0x60] sm:$0xff] }
  0xe9   :  { %1377 = vmatprep.subr.mxu0 %v1115_v20 }
  0xea   :  { %1378 = vmatpush3.msra.mxu0 %v1115_v20 }
  0xf1   :  { %v1332_v22 = vpop.f32.mrf.mxu0 }
  0xf2   :  { %v1795_v28 = vadd.f32 %v1332_v22, %v356_v23  ;;  %v1114_v22 = vld [vmem:[%s2084_s2 + $0xd8] sm:$0xff]  ;;  %v651_v23 = vld [vmem:[%s2084_s2 + $0x68] sm:$0xff] }
  0xf3   :  { %v456_v27 = vpop.f32.mrf.mxu0  ;;  %1379 = vmatprep.subr.mxu0 %v1114_v22 }
  0xf4   :  { %v1797_v29 = vadd.f32 %v456_v27, %v351_v24  ;;  %v491_v36 = vmul.f32 %v1795_v28, %v1795_v28  ;;  %1380 = vmatpush3.msra.mxu0 %v1114_v22  ;;  %v1113_v24 = vld [vmem:[%s2084_s2 + $0xd0] sm:$0xff]  ;;  %v1112_v27 = vld [vmem:[%s2084_s2 + $0xc8] sm:$0xff] }
  0xf5   :  { %v1335_v30 = vpop.f32.mrf.mxu0  ;;  %1381 = vmatprep.subr.mxu0 %v1113_v24 }
  0xf6   :  { %v490_v34 = vmul.f32 %v1797_v29, %v1797_v29  ;;  %v481_v37 = vadd.f32 %v1795_v28, %v1797_v29  ;;  %v1805_v38 = vadd.f32 %v1335_v30, %v366_v31  ;;  %1382 = vmatpush3.msra.mxu0 %v1113_v24  ;;  %v649_v30 = vld [vmem:[%s2084_s2 + $0x58] sm:$0xff]  ;;  %v1111_v31 = vld [vmem:[%s2084_s2 + $0xc0] sm:$0xff] }
  0xf7   :  { %v466_v35 = vpop.f32.mrf.mxu0  ;;  %1383 = vmatprep.subr.mxu0 %v1112_v27 }
  0xf8   :  { %v1807_v39 = vadd.f32 %v466_v35, %v361_v33  ;;  %v494_v40 = vadd.f32 %v491_v36, %v490_v34  ;;  %v493_v43 = vmul.f32 %v1805_v38, %v1805_v38  ;;  %1384 = vmatpush3.msra.mxu0 %v1112_v27  ;;  %v648_v33 = vld [vmem:[%s2084_s2 + $0x50] sm:$0xff]  ;;  %v1110_v34 = vld [vmem:[%s2084_s2 + $0xb8] sm:$0xff]  ;;  %v647_v35 = vld [vmem:[%s2084_s2 + $0x48] sm:$0xff] }
  0xf9   :  { %1385 = vmatprep.subr.mxu0 %v1111_v31  ;;  %v1109_v36 = vld [vmem:[%s2084_s2 + $0xb0] sm:$0xff] }
  0xfa   :  { %v482_v41 = vadd.f32 %v481_v37, %v1807_v39  ;;  %v492_v42 = vmul.f32 %v1807_v39, %v1807_v39  ;;  %1386 = vmatpush3.msra.mxu0 %v1111_v31  ;;  %v646_v37 = vld [vmem:[%s2084_s2 + $0x40] sm:$0xff] }
  0xfb   :  { %1387 = vmatprep.subr.mxu0 %v1110_v34  ;;  %v1102_v31 = vld [vmem:[%s2086_s4 + $0x1] ss:$0 sm:$0xff] }
  0xfc   :  { %v483_v44 = vadd.f32 %v482_v41, %v1805_v38  ;;  %v495_v45 = vadd.f32 %v494_v40, %v492_v42  ;;  %1388 = vmatpush3.msra.mxu0 %v1110_v34  ;;  %v1108_v40 = vld [vmem:[%s2084_s2 + $0xa8] sm:$0xff]  ;;  %v645_v41 = vld [vmem:[%s2084_s2 + $0x38] sm:$0xff]  ;;  %v1107_v42 = vld [vmem:[%s2084_s2 + $0xa0] sm:$0xff] }
  0xfd   :  { %1389 = vmatprep.subr.mxu0 %v1109_v36 }
  0xfe   :  { %v484_v46 = vrot.slane %v483_v44, 4  ;;  %v496_v47 = vadd.f32 %v495_v45, %v493_v43  ;;  %1390 = vmatpush3.msra.mxu0 %v1109_v36  ;;  %v644_v43 = vld [vmem:[%s2084_s2 + $0x30] sm:$0xff]  ;;  %v643_v45 = vld [vmem:[%s2084_s2 + $0x28] sm:$0xff] }
  0xff   :  { %1391 = vmatprep.subr.mxu0 %v1108_v40 }
 0x100   :  { %v485_v48 = vadd.f32 %v484_v46, %v483_v44  ;;  %v497_v49 = vrot.slane %v496_v47, 4  ;;  %1392 = vmatpush3.msra.mxu0 %v1108_v40  ;;  %v1106_v44 = vld [vmem:[%s2084_s2 + $0x98] sm:$0xff]  ;;  %v1105_v46 = vld [vmem:[%s2084_s2 + $0x90] sm:$0xff] }
 0x101   :  { %1393 = vmatprep.subr.mxu0 %v1107_v42 }
 0x102   :  { %v486_v50 = vrot.slane %v485_v48, 2  ;;  %v498_v52 = vadd.f32 %v497_v49, %v496_v47  ;;  %1394 = vmatpush3.msra.mxu0 %v1107_v42  ;;  %v642_v47 = vld [vmem:[%s2084_s2 + $0x20] sm:$0xff]  ;;  %v641_v49 = vld [vmem:[%s2084_s2 + $0x18] sm:$0xff] }
 0x103   :  { %1395 = vmatprep.subr.mxu0 %v1106_v44 }
 0x104   :  { %v487_v53 = vadd.f32 %v486_v50, %v485_v48  ;;  %v499_v54 = vrot.slane %v498_v52, 2  ;;  %1396 = vmatpush3.msra.mxu0 %v1106_v44  ;;  %v1104_v48 = vld [vmem:[%s2084_s2 + $0x88] sm:$0xff]  ;;  %v1103_v50 = vld [vmem:[%s2084_s2 + $0x80] sm:$0xff] }
 0x105   :  { %1397 = vmatprep.subr.mxu0 %v1105_v46 }
 0x106   :  { %v488_v55 = vrot.slane %v487_v53, 1  ;;  %v500_v56 = vadd.f32 %v499_v54, %v498_v52  ;;  %1398 = vmatpush3.msra.mxu0 %v1105_v46  ;;  %v640_v52 = vld [vmem:[%s2084_s2 + $0x10] sm:$0xff]  ;;  %v1136_v54 = vld [vmem:[%s2084_s2 + $0x178] sm:$0xff] }
 0x107   :  { %1399 = vmatprep.subr.mxu0 %v1104_v48 }
 0x108   :  { %v501_v57 = vrot.slane %v500_v56, 1  ;;  %v489_v59 = vadd.f32 %v488_v55, %v487_v53  ;;  %1400 = vmatpush3.msra.mxu0 %v1104_v48  ;;  %v639_v53 = vld [vmem:[%s2084_s2 + $0x8] sm:$0xff]  ;;  %v638_v55 = vld [vmem:[%s2084_s2] sm:$0xff] }
 0x109   :  { %1401 = vmatprep.subr.mxu0 %v1103_v50 }
 0x10a   :  { %v502_v60 = vadd.f32 %v501_v57, %v500_v56  ;;  %1402 = vmatpush3.msra.mxu0 %v1103_v50  ;;  %v1134_v50 = vld [vmem:[%s2084_s2 + $0x168] sm:$0xff] }
 0x10b   :  { %1447 = vmatprep.subr.mxu0 %v1136_v54 }
 0x10c   :  { %v504_v15 = vsel %vm503_vm8, %v489_v59, %v502_v60 }
 0x10d   :  { %1369 = vmatmul.mubr.f32.vlgmr.msra.gmra.mxu1 %v504_v15 }
 0x10e   :  { %1410 = vmatpush3.msra.mxu1 %v653_v19  ;;  %v479_v19 = vld [vmem:[%s2086_s4] sm:$0x1] }
 0x10f   :  { %1411 = vmatprep.subr.mxu1 %v652_v21 }
 0x110   :  { %1412 = vmatpush3.msra.mxu1 %v652_v21 }
 0x111   :  { %1413 = vmatprep.subr.mxu1 %v651_v23 }
 0x112   :  { %1414 = vmatpush3.msra.mxu1 %v651_v23 }
 0x113   :  { %1415 = vmatprep.subr.mxu1 %v650_v25 }
 0x114   :  { %1416 = vmatpush3.msra.mxu1 %v650_v25 }
 0x115   :  { %1417 = vmatprep.subr.mxu1 %v649_v30 }
 0x116   :  { %1418 = vmatpush3.msra.mxu1 %v649_v30 }
 0x117   :  { %1419 = vmatprep.subr.mxu1 %v648_v33 }
 0x118   :  { %1420 = vmatpush3.msra.mxu1 %v648_v33 }
 0x119   :  { %1421 = vmatprep.subr.mxu1 %v647_v35 }
 0x11a   :  { %1422 = vmatpush3.msra.mxu1 %v647_v35 }
 0x11b   :  { %1423 = vmatprep.subr.mxu1 %v646_v37 }
 0x11c   :  { %1424 = vmatpush3.msra.mxu1 %v646_v37 }
 0x11d   :  { %1425 = vmatprep.subr.mxu1 %v645_v41 }
 0x11e   :  { %1426 = vmatpush3.msra.mxu1 %v645_v41 }
 0x11f   :  { %1427 = vmatprep.subr.mxu1 %v644_v43 }
 0x120   :  { %1428 = vmatpush3.msra.mxu1 %v644_v43 }
 0x121   :  { %1429 = vmatprep.subr.mxu1 %v643_v45 }
 0x122   :  { %1430 = vmatpush3.msra.mxu1 %v643_v45 }
 0x123   :  { %1431 = vmatprep.subr.mxu1 %v642_v47 }
 0x124   :  { %1432 = vmatpush3.msra.mxu1 %v642_v47 }
 0x125   :  { %1433 = vmatprep.subr.mxu1 %v641_v49 }
 0x126   :  { %1434 = vmatpush3.msra.mxu1 %v641_v49 }
 0x127   :  { %1435 = vmatprep.subr.mxu1 %v640_v52 }
 0x128   :  { %1436 = vmatpush3.msra.mxu1 %v640_v52 }
 0x129   :  { %1437 = vmatprep.subr.mxu1 %v639_v53 }
 0x12a   :  { %1438 = vmatpush3.msra.mxu1 %v639_v53 }
 0x12b   :  { %1439 = vmatprep.subr.mxu1 %v638_v55 }
 0x12c   :  { %1440 = vmatpush3.msra.mxu1 %v638_v55 }
 0x12d   :  { %1485 = vmatprep.subr.mxu1 %v1554_v62 }
 0x1cd   :  { %v571_v56 = vpop.f32.mrf.mxu1 }
 0x1ce   :  { %v575_v57 = vmul.f32 %v571_v56, %v571_v56  ;;  %v589_v20 = vrot.slane %v571_v56, %v1917_v17 }
 0x1cf   :  { %v1370_v59 = vpop.f32.mrf.mxu1 }
 0x1d0   :  { %v577_v60 = vrot.slane %v575_v57, 7  ;;  %v591_v23 = vsub.f32 %v1795_v28, %v589_v20  ;;  %v593_v24 = vsub.f32 %v1805_v38, %v589_v20  ;;  %v590_v27 = vsub.f32 %v1797_v29, %v589_v20  ;;  %v1130_v59 = vld [vmem:[%s2084_s2 + $0x148] sm:$0xff] }
 0x1d1   :  { %v592_v30 = vsub.f32 %v1807_v39, %v589_v20  ;;  %v1135_v39 = vld [vmem:[%s2084_s2 + $0x170] sm:$0xff] }
 0x1d2   :  { %v579_v15 = vsub.f32 %v571_v56, %v577_v60  ;;  %v1132_v56 = vld [vmem:[%s2084_s2 + $0x158] sm:$0xff]  ;;  %v1129_v60 = vld [vmem:[%s2084_s2 + $0x140] sm:$0xff] }
 0x1d4   :  { %v580_v16 = vadd.f32 1e-05, %v579_v15  ;;  %v1121_v15 = vld [vmem:[%s2084_s2 + $0x100] sm:$0xff] }
 0x1d6   :  { %1525 = vrsqrt.f32 %v580_v16 }
 0x1e3   :  { %v1526_v18 = vpop.eup %1525 }
 0x1e4   :  { %v583_v21 = vrot.slane %v1526_v18, 1 }
 0x1e6   :  { %v585_v22 = vmul.f32 %v583_v21, %v479_v19 }
 0x1e8   :  { %v597_v25 = vrot.slane %v585_v22, %v1917_v17 }
 0x1ea   :  { %v599_v33 = vmul.f32 %v597_v25, %v591_v23  ;;  %v601_v34 = vmul.f32 %v597_v25, %v593_v24  ;;  %v598_v35 = vmul.f32 %v597_v25, %v590_v27  ;;  %v600_v36 = vmul.f32 %v597_v25, %v592_v30 }
 0x1ec   :  { %v606_v37 = vadd.f32 %v1102_v31, %v598_v35  ;;  %v609_v40 = vadd.f32 %v1102_v31, %v601_v34  ;;  %v607_v41 = vadd.f32 %v1102_v31, %v599_v33  ;;  %v608_v28 = vadd.f32 %v1102_v31, %v600_v36 }
 0x1ee   :  { %v1931_v42 = vmax.f32 %v606_v37, 0.0  ;;  %v1933_v38 = vmax.f32 %v607_v41, 0.0  ;;  %v1935_v43 = vmax.f32 %v608_v28, 0.0  ;;  %v1937_v29 = vmax.f32 %v609_v40, 0.0 }
 0x1f0   :  { %1403 = vmatprep.mubr.f32.mxu0 %v1931_v42  ;;  %v614_v44 = vrot.slane %v1931_v42, 7  ;;  %v617_v45 = vrot.slane %v1937_v29, 7  ;;  %v615_v46 = vrot.slane %v1933_v38, 7  ;;  %v616_v47 = vrot.slane %v1935_v43, 7 }
 0x1f1   :  { %1404 = vmatmul.mubr.f32.vlgmr.msra.gmra.mxu0 %v1933_v38  ;;  %v626_v52 = vrot.slane %v1931_v42, 1  ;;  %v627_v53 = vrot.slane %v1933_v38, 1 }
 0x1f2   :  { %1448 = vmatpush3.msra.mxu0 %v1136_v54  ;;  %1406 = vmatprep.mubr.f32.mxu0 %v1935_v43  ;;  %v621_v48 = vsel %vm119_vm0, %v617_v45, %v614_v44  ;;  %v620_v49 = vsel %vm119_vm0, %v614_v44, %v615_v46  ;;  %v1133_v54 = vld [vmem:[%s2084_s2 + $0x160] sm:$0xff]  ;;  %v619_v55 = vsel %vm119_vm0, %v615_v46, %v616_v47 }
 0x1f3   :  { %1449 = vmatprep.subr.mxu0 %v1135_v39  ;;  %1441 = vmatprep.mubr.msk.f32.mxu1 %vm1617_vm1, %v621_v48  ;;  %v632_v26 = vsel %vm140_vm4, %v626_v52, %v627_v53  ;;  %v618_v57 = vsel %vm119_vm0, %v616_v47, %v617_v45 }
 0x1f4   :  { %1450 = vmatpush3.msra.mxu0 %v1135_v39  ;;  %1442 = vmatmul.mubr.f32.vlgmr.msra.gmra.mxu1 %v620_v49 }
 0x1f5   :  { %1451 = vmatprep.subr.mxu0 %v1134_v50  ;;  %1407 = vmatmul.mubr.f32.gmra.mxu0 %v1937_v29 }
 0x1f6   :  { %1444 = vmatprep.mubr.msk.f32.mxu1 %vm1626_vm3, %v619_v55  ;;  %1452 = vmatpush3.msra.mxu0 %v1134_v50 }
 0x1f7   :  { %1453 = vmatprep.subr.mxu0 %v1133_v54  ;;  %1479 = vmatprep.mubr.f32.mxu0 %v632_v26 }
 0x1f8   :  { %1454 = vmatpush3.msra.mxu0 %v1133_v54  ;;  %1445 = vmatmul.mubr.f32.gmra.mxu1 %v618_v57 }
 0x1f9   :  { %1455 = vmatprep.subr.mxu0 %v1132_v56  ;;  %1486 = vmatpush3.msra.mxu1 %v1684_v61  ;;  %v1128_v61 = vld [vmem:[%s2084_s2 + $0x138] sm:$0xff] }
 0x1fa   :  { %1456 = vmatpush3.msra.mxu0 %v1132_v56  ;;  %1487 = vmatprep.subr.mxu1 %v1554_v62 }
 0x1fb   :  { %1457 = vmatprep.subr.mxu0 %v1131_v32  ;;  %1488 = vmatpush3.msra.mxu1 %v1690_v63  ;;  %v1127_v63 = vld [vmem:[%s2084_s2 + $0x130] sm:$0xff] }
 0x1fc   :  { %1458 = vmatpush3.msra.mxu0 %v1131_v32  ;;  %1489 = vmatprep.subr.mxu1 %v1554_v62 }
 0x1fd   :  { %1459 = vmatprep.subr.mxu0 %v1130_v59  ;;  %1490 = vmatpush3.msra.mxu1 %v1699_v0  ;;  %v1126_v0 = vld [vmem:[%s2084_s2 + $0x128] sm:$0xff] }
 0x1fe   :  { %1460 = vmatpush3.msra.mxu0 %v1130_v59  ;;  %1491 = vmatprep.subr.mxu1 %v1554_v62 }
 0x1ff   :  { %1461 = vmatprep.subr.mxu0 %v1129_v60  ;;  %1492 = vmatpush3.msra.mxu1 %v1706_v1  ;;  %v1125_v1 = vld [vmem:[%s2084_s2 + $0x120] sm:$0xff] }
 0x200   :  { %1462 = vmatpush3.msra.mxu0 %v1129_v60  ;;  %1493 = vmatprep.subr.mxu1 %v1554_v62 }
 0x201   :  { %1463 = vmatprep.subr.mxu0 %v1128_v61  ;;  %1494 = vmatpush3.msra.mxu1 %v1713_v2  ;;  %v1124_v2 = vld [vmem:[%s2084_s2 + $0x118] sm:$0xff] }
 0x202   :  { %1464 = vmatpush3.msra.mxu0 %v1128_v61  ;;  %1495 = vmatprep.subr.mxu1 %v1554_v62  ;;  %v947_v61 = vld [vmem:[%s2086_s4 + $0x2] sm:$0x1] }
 0x203   :  { %1465 = vmatprep.subr.mxu0 %v1127_v63  ;;  %1496 = vmatpush3.msra.mxu1 %v1720_v3  ;;  %v1123_v3 = vld [vmem:[%s2084_s2 + $0x110] sm:$0xff] }
 0x204   :  { %1466 = vmatpush3.msra.mxu0 %v1127_v63  ;;  %1497 = vmatprep.subr.mxu1 %v1554_v62 }
 0x205   :  { %1467 = vmatprep.subr.mxu0 %v1126_v0  ;;  %1498 = vmatpush3.msra.mxu1 %v1727_v4  ;;  %v1122_v4 = vld [vmem:[%s2084_s2 + $0x108] sm:$0xff] }
 0x206   :  { %1468 = vmatpush3.msra.mxu0 %v1126_v0  ;;  %1499 = vmatprep.subr.mxu1 %v1554_v62 }
 0x207   :  { %1469 = vmatprep.subr.mxu0 %v1125_v1  ;;  %1500 = vmatpush3.msra.mxu1 %v1734_v5  ;;  %v628_v5 = vrot.slane %v1935_v43, 1 }
 0x208   :  { %1470 = vmatpush3.msra.mxu0 %v1125_v1  ;;  %1501 = vmatprep.subr.mxu1 %v1554_v62 }
 0x209   :  { %1471 = vmatprep.subr.mxu0 %v1124_v2  ;;  %1502 = vmatpush3.msra.mxu1 %v1741_v6  ;;  %v629_v6 = vrot.slane %v1937_v29, 1 }
 0x20a   :  { %1472 = vmatpush3.msra.mxu0 %v1124_v2  ;;  %1503 = vmatprep.subr.mxu1 %v1554_v62 }
 0x20b   :  { %1473 = vmatprep.subr.mxu0 %v1123_v3  ;;  %1504 = vmatpush3.msra.mxu1 %v1748_v8  ;;  %v631_v8 = vsel %vm140_vm4, %v627_v53, %v628_v5 }
 0x20c   :  { %1474 = vmatpush3.msra.mxu0 %v1123_v3  ;;  %1505 = vmatprep.subr.mxu1 %v1554_v62 }
 0x20d   :  { %1475 = vmatprep.subr.mxu0 %v1122_v4  ;;  %1506 = vmatpush3.msra.mxu1 %v1755_v9  ;;  %v630_v9 = vsel %vm140_vm4, %v628_v5, %v629_v6 }
 0x20e   :  { %1476 = vmatpush3.msra.mxu0 %v1122_v4  ;;  %1507 = vmatprep.subr.mxu1 %v1554_v62 }
 0x20f   :  { %1477 = vmatprep.subr.mxu0 %v1121_v15  ;;  %1508 = vmatpush3.msra.mxu1 %v1762_v10  ;;  %v633_v10 = vsel %vm140_vm4, %v629_v6, %v626_v52  ;;  %v1139_v6 = vld [vmem:[%s2086_s4 + $0x3] ss:$0 sm:$0xff] }
 0x210   :  { %1478 = vmatpush3.msra.mxu0 %v1121_v15  ;;  %1509 = vmatprep.subr.mxu1 %v1554_v62 }
 0x211   :  { %1480 = vmatmul.mubr.msk.f32.vlgmr.msra.gmra.mxu0 %vm1659_vm5, %v631_v8  ;;  %1510 = vmatpush3.msra.mxu1 %v1768_v11 }
 0x212   :  { %1482 = vmatprep.mubr.f32.mxu0 %v630_v9  ;;  %1511 = vmatprep.subr.mxu1 %v1554_v62 }
 0x213   :  { %1512 = vmatpush3.msra.mxu1 %v1774_v12  ;;  %1517 = vmatprep.mubr.msk.f32.mxu1 %vm1555_vm7, %v1554_v62 }
 0x214   :  { %1513 = vmatprep.subr.mxu1 %v1554_v62 }
 0x215   :  { %1483 = vmatmul.mubr.msk.f32.gmra.mxu0 %vm1670_vm6, %v633_v10  ;;  %1514 = vmatpush3.msra.mxu1 %v1783_v13 }
 0x216   :  { %1515 = vmatprep.subr.mxu1 %v1554_v62 }
 0x217   :  { %1516 = vmatpush3.msra.mxu1 %v1790_v14 }
 0x2b1   :  { %v1405_v51 = vpop.f32.mrf.mxu0 }
 0x2b3   :  { %v737_v11 = vpop.f32.mrf.mxu0 }
 0x2b4   :  { %v1443_v12 = vpop.f32.mrf.mxu1 }
 0x2b5   :  { %v1408_v16 = vpop.f32.mrf.mxu0  ;;  %v828_v21 = vadd.f32 %v1443_v12, %v1405_v51 }
 0x2b6   :  { %v822_v18 = vpop.f32.mrf.mxu1 }
 0x2b7   :  { %v747_v19 = vpop.f32.mrf.mxu0  ;;  %v823_v22 = vadd.f32 %v822_v18, %v737_v11 }
 0x2b8   :  { %v1446_v20 = vpop.f32.mrf.mxu1 }
 0x2b9   :  { %v838_v13 = vadd.f32 %v1446_v20, %v1408_v16 }
 0x2ba   :  { %v832_v23 = vpop.f32.mrf.mxu1 }
 0x2bb   :  { %v833_v30 = vadd.f32 %v832_v23, %v747_v19 }
 0x2d1   :  { %v1481_v7 = vpop.f32.mrf.mxu0 }
 0x2d2   :  { %v944_v58 = vadd.f32 %v1481_v7, %v828_v21 }
 0x2d3   :  { %v924_v24 = vpop.f32.mrf.mxu0 }
 0x2d4   :  { %v943_v25 = vadd.f32 %v924_v24, %v823_v22  ;;  %v959_v14 = vmul.f32 %v944_v58, %v944_v58 }
 0x2d5   :  { %v1484_v27 = vpop.f32.mrf.mxu0 }
 0x2d6   :  { %v958_v62 = vmul.f32 %v943_v25, %v943_v25  ;;  %v949_v33 = vadd.f32 %v944_v58, %v943_v25  ;;  %v946_v34 = vadd.f32 %v1484_v27, %v838_v13 }
 0x2d7   :  { %v934_v31 = vpop.f32.mrf.mxu0 }
 0x2d8   :  { %v945_v35 = vadd.f32 %v934_v31, %v833_v30  ;;  %v962_v36 = vadd.f32 %v959_v14, %v958_v62  ;;  %v961_v41 = vmul.f32 %v946_v34, %v946_v34 }
 0x2da   :  { %v950_v37 = vadd.f32 %v949_v33, %v945_v35  ;;  %v960_v40 = vmul.f32 %v945_v35, %v945_v35 }
 0x2dc   :  { %v951_v28 = vadd.f32 %v950_v37, %v946_v34  ;;  %v963_v42 = vadd.f32 %v962_v36, %v960_v40 }
 0x2de   :  { %v952_v38 = vrot.slane %v951_v28, 4  ;;  %v964_v43 = vadd.f32 %v963_v42, %v961_v41 }
 0x2e0   :  { %v953_v29 = vadd.f32 %v952_v38, %v951_v28  ;;  %v965_v39 = vrot.slane %v964_v43, 4 }
 0x2e2   :  { %v954_v44 = vrot.slane %v953_v29, 2  ;;  %v966_v45 = vadd.f32 %v965_v39, %v964_v43 }
 0x2e4   :  { %v955_v46 = vadd.f32 %v954_v44, %v953_v29  ;;  %v967_v47 = vrot.slane %v966_v45, 2 }
 0x2e6   :  { %v956_v48 = vrot.slane %v955_v46, 1  ;;  %v968_v49 = vadd.f32 %v967_v47, %v966_v45 }
 0x2e8   :  { %v969_v50 = vrot.slane %v968_v49, 1  ;;  %v957_v52 = vadd.f32 %v956_v48, %v955_v46 }
 0x2ea   :  { %v970_v53 = vadd.f32 %v969_v50, %v968_v49 }
 0x2ec   :  { %v971_v54 = vsel %vm503_vm8, %v957_v52, %v970_v53 }
 0x2ed   :  { %1518 = vmatmul.mubr.f32.vlgmr.msra.gmra.mxu1 %v971_v54 }
 0x3ad   :  { %v1038_v55 = vpop.f32.mrf.mxu1 }
 0x3ae   :  { %v1042_v26 = vmul.f32 %v1038_v55, %v1038_v55  ;;  %v1056_v63 = vrot.slane %v1038_v55, %v1917_v17 }
 0x3af   :  { %v1519_v56 = vpop.f32.mrf.mxu1 }
 0x3b0   :  { %v1044_v57 = vrot.slane %v1042_v26, 7  ;;  %v1057_v2 = vsub.f32 %v943_v25, %v1056_v63  ;;  %v1058_v3 = vsub.f32 %v944_v58, %v1056_v63  ;;  %v1059_v4 = vsub.f32 %v945_v35, %v1056_v63 }
 0x3b1   :  { %v1060_v5 = vsub.f32 %v946_v34, %v1056_v63 }
 0x3b2   :  { %v1046_v32 = vsub.f32 %v1038_v55, %v1044_v57 }
 0x3b4   :  { %v1047_v59 = vadd.f32 1e-05, %v1046_v32 }
 0x3b6   :  { %1527 = vrsqrt.f32 %v1047_v59 }
 0x3c3   :  { %v1528_v60 = vpop.eup %1527 }
 0x3c4   :  { %v1050_v0 = vrot.slane %v1528_v60, 1 }
 0x3c6   :  { %v1052_v1 = vmul.f32 %v1050_v0, %v947_v61 }
 0x3c8   :  { %v1064_v15 = vrot.slane %v1052_v1, %v1917_v17 }
 0x3ca   :  { %v1065_v8 = vmul.f32 %v1064_v15, %v1057_v2  ;;  %v1066_v9 = vmul.f32 %v1064_v15, %v1058_v3  ;;  %v1067_v10 = vmul.f32 %v1064_v15, %v1059_v4  ;;  %v1068_v51 = vmul.f32 %v1064_v15, %v1060_v5 }
 0x3cc   :  { %v1073_v11 = vadd.f32 %v1139_v6, %v1065_v8  ;;  %v1074_v12 = vadd.f32 %v1139_v6, %v1066_v9  ;;  %v1075_v16 = vadd.f32 %v1139_v6, %v1067_v10  ;;  %v1076_v18 = vadd.f32 %v1139_v6, %v1068_v51 }
 0x3ce   :  { %v1077_v19 = vmax.f32 %v1073_v11, 0.0  ;;  %v1078_v20 = vmax.f32 %v1074_v12, 0.0  ;;  %v1079_v7 = vmax.f32 %v1075_v16, 0.0  ;;  %v1080_v21 = vmax.f32 %v1076_v18, 0.0 }
 0x3d0   :  { %1081 = vst [vmem:[%s2087_s5] sm:$0xff] %v1077_v19  ;;  %1082 = vst [vmem:[%s2087_s5 + $0x8] sm:$0xff] %v1078_v20 }
 0x3d1   :  { %1083 = vst [vmem:[%s2087_s5 + $0x10] sm:$0xff] %v1079_v7  ;;  %1084 = vst [vmem:[%s2087_s5 + $0x18] sm:$0xff] %v1080_v21 }
 0x3d2   :  { %1089 = vsyncpa [#allocation3], 1 }

</bundles_post_ra>
